<compile_context>
chip_gen: v7x
topology: tpu7x:2x2x1
jax: 0.10.0
libtpu: 0.0.40
codegen_flags: <defaults>
</compile_context>

<pallas_src>
import functools

import jax
import jax.numpy as jnp
from jax.experimental import pallas as pl
from jax.experimental.pallas import tpu as pltpu


# ------------------------------- kernel --------------------------------------

def _noise_block_kernel(noise_ref, x_ref, w1_ref, w2_ref, b_ref, o_ref, *,
                        mxu_dtype):
    """One (NB, C, TL) batch x spatial block of the whole NoiseBasicBlock.

    noise_ref: SMEM (2,)      scalar noise values [n1, n2]
    x_ref    : (NB, C, TL)    input block, lane-dense spatial axis
    w1_ref   : (C, C) f32     BN-folded conv1 weight, (out, in) layout
    w2_ref   : (C, C) f32     BN-folded conv2 weight, (out, in) layout
    b_ref    : (C, 2) f32     BN-folded biases, columns [b1', b2']
    o_ref    : (NB, C, TL)    output block
    """
    n1 = noise_ref[0]
    n2 = noise_ref[1]
    # Fused ReLU pair constant: relu(relu(h) + n2) == max(h + n2, max(n2, 0)).
    relu_n2 = jnp.maximum(n2, 0.0)

    w1 = w1_ref[...]
    w2 = w2_ref[...]
    if mxu_dtype is not None:           # native bf16 MXU path (v6e/v7x, large C)
        w1 = w1.astype(mxu_dtype)
        w2 = w2.astype(mxu_dtype)
    b1 = b_ref[:, 0:1]
    b2 = b_ref[:, 1:2]

    def maybe_cast(h):
        return h if mxu_dtype is None else h.astype(mxu_dtype)

    nb = x_ref.shape[0]
    for b in range(nb):                 # small static unroll over the batch sub-block
        # NoiseLayer 1: scalar noise add + ReLU; BN1 + Conv1x1 + bias + BN2 folded.
        h = jnp.maximum(x_ref[b].astype(jnp.float32) + n1, 0.0)
        h = jnp.dot(w1, maybe_cast(h), preferred_element_type=jnp.float32) + b1
        # MaxPool2d(1,1) is identity; fused ReLU -> +noise -> ReLU pair.
        h = jnp.maximum(h + n2, relu_n2)
        # NoiseLayer 2: BN3 + Conv1x1 + bias + BN4 folded.
        h = jnp.dot(w2, maybe_cast(h), preferred_element_type=jnp.float32) + b2
        # Residual add (re-read x from the resident VMEM block -> short live
        # range, no full-tile f32 copy held across both matmuls) + final ReLU.
        o_ref[b] = jnp.maximum(h + x_ref[b].astype(jnp.float32),
                               0.0).astype(o_ref.dtype)


# ------------------------------- wrapper --------------------------------------

def _pick_spatial_tile(hw, tl_max):
    # Use the full spatial extent whenever it fits (legal full-dim block; avoids
    # masked tail lanes for non-multiple-of-128 ResNet spatial sizes).
    if hw <= tl_max:
        return hw
    return max(128, (tl_max // 128) * 128)


def _pick_batch_block(n, c, tl, itemsize, target_bytes=2 << 20, max_unroll=16):
    """Batch sub-block so each grid step moves ~1-2 MiB (amortize step overhead)."""
    per_batch = max(1, c * tl * itemsize)
    nb = max(1, min(n, max_unroll, target_bytes // per_batch))
    return int(nb)


def noise_basic_block(x_nchw, w1_folded, b1_folded, w2_folded, b2_folded,
                      noise, *, tl_max=1024, io_dtype=None, mxu_dtype=None):
    """NoiseBasicBlock forward.

    x_nchw        : (N, C, H, W)
    w{1,2}_folded : (C, C)  BN-folded 1x1-conv weights, (out, in) layout
    b{1,2}_folded : (C,)    BN-folded biases
    noise         : (2,)    scalar noise values [n1, n2] (batch != 1 path)
    tl_max        : max spatial tile width (lanes) when HW is very large.
    io_dtype      : dtype for HBM I/O of x / output (jnp.bfloat16 halves HBM
                    traffic on v6e/v7x); weights/biases and compute stay f32.
    mxu_dtype     : if set (e.g. jnp.bfloat16), both matmul operands are cast to
                    it so the MXU runs its native low-precision path (only
                    matters once C is large enough to be compute-relevant).
    """
    N, C, H, W = x_nchw.shape
    HW = H * W
    if io_dtype is None:
        io_dtype = x_nchw.dtype

    # Free reshape: NCHW is already contiguous as (N, C, H*W). No transposes.
    x3d = x_nchw.reshape(N, C, HW).astype(io_dtype)
    # Weights/biases stay float32: constant index_maps -> DMA'd once, resident.
    w1 = w1_folded.astype(jnp.float32)
    w2 = w2_folded.astype(jnp.float32)
    biases = jnp.stack([b1_folded, b2_folded], axis=1).astype(jnp.float32)  # (C, 2)
    noise = noise.astype(jnp.float32)

    itemsize = jnp.dtype(io_dtype).itemsize
    tl = _pick_spatial_tile(HW, tl_max)
    nb = _pick_batch_block(N, C, tl, itemsize)
    # v7x megacore: keep at least 2 grid steps when there is work to split.
    if N > 1 and pl.cdiv(N, nb) * pl.cdiv(HW, tl) < 2:
        nb = max(1, (N + 1) // 2)
    grid = (pl.cdiv(N, nb), pl.cdiv(HW, tl))

    # VMEM budget: double-buffered in+out blocks + resident f32 params + slack.
    block_bytes = nb * C * tl * itemsize
    param_bytes = (2 * C * C + 2 * C) * 4
    vmem_need = 4 * block_bytes + 2 * param_bytes + (2 << 20)
    # Explicit limit: v5e's default scoped VMEM is only 16 MiB; cap well under
    # v7x's 64 MiB physical VMEM.
    vmem_limit = int(min(max(vmem_need, 32 << 20), 48 << 20))

    out3d = pl.pallas_call(
        functools.partial(_noise_block_kernel, mxu_dtype=mxu_dtype),
        out_shape=jax.ShapeDtypeStruct((N, C, HW), io_dtype),
        grid=grid,
        in_specs=[
            pl.BlockSpec(memory_space=pltpu.MemorySpace.SMEM),           # noise scalars
            pl.BlockSpec((nb, C, tl), lambda bi, si: (bi, 0, si)),       # x block
            pl.BlockSpec((C, C), lambda bi, si: (0, 0)),                 # W1' (resident)
            pl.BlockSpec((C, C), lambda bi, si: (0, 0)),                 # W2' (resident)
            pl.BlockSpec((C, 2), lambda bi, si: (0, 0)),                 # biases
        ],
        out_specs=pl.BlockSpec((nb, C, tl), lambda bi, si: (bi, 0, si)),
        compiler_params=pltpu.CompilerParams(
            dimension_semantics=("parallel", "parallel"),
            vmem_limit_bytes=vmem_limit),
    )(noise, x3d, w1, w2, biases)

    return out3d.reshape(N, C, H, W)


# ----------------------------- host-side helpers -----------------------------

def _bn_scale_shift(gamma, beta, mean, var, eps=1e-5):
    scale = gamma / jnp.sqrt(var + eps)
    shift = beta - mean * scale
    return scale, shift


def _fold_noise_layer(w_oi, bias, bn_in, bn_out, eps=1e-5):
    """Fold bn_in (before conv) and bn_out (after conv) + conv bias into (W', b')."""
    s_in, h_in = _bn_scale_shift(*bn_in, eps=eps)
    s_out, h_out = _bn_scale_shift(*bn_out, eps=eps)
    w_f = s_out[:, None] * w_oi * s_in[None, :]
    b_f = s_out * (w_oi @ h_in + bias) + h_out
    return w_f, b_f


def _reference_nchw(x, w1_oi, b1, w2_oi, b2, bns, n1, n2, eps=1e-5):
    """Pure-JAX NCHW reference mirroring the PyTorch forward (eval-mode BN)."""
    def bn(t, p):
        s, h = _bn_scale_shift(*p, eps=eps)
        return t * s[None, :, None, None] + h[None, :, None, None]

    bn1, bn2p, bn3, bn4 = bns
    y = jnp.maximum(x + n1, 0.0)
    y = bn(y, bn1)
    y = jnp.einsum('oc,nchw->nohw', w1_oi, y) + b1[None, :, None, None]
    # MaxPool2d(1, 1) identity
    y = bn(y, bn2p)
    y = jnp.maximum(y, 0.0)
    y = jnp.maximum(y + n2, 0.0)
    y = bn(y, bn3)
    y = jnp.einsum('oc,nchw->nohw', w2_oi, y) + b2[None, :, None, None]
    y = bn(y, bn4)
    return jnp.maximum(y + x, 0.0)


def _run_case(seed, N, C, H, W, io_dtype, atol, rtol):
    key = jax.random.PRNGKey(seed)
    keys = jax.random.split(key, 20)

    x = jax.random.normal(keys[0], (N, C, H, W), jnp.float32)

    # Conv1x1 weights/biases (torch layout (out, in, 1, 1) -> (out, in)).
    w1_oi = jax.random.normal(keys[1], (C, C), jnp.float32) * 0.3
    b1 = jax.random.normal(keys[2], (C,), jnp.float32) * 0.1
    w2_oi = jax.random.normal(keys[3], (C, C), jnp.float32) * 0.3
    b2 = jax.random.normal(keys[4], (C,), jnp.float32) * 0.1

    # Four BatchNorm2d layers: deterministic eval-mode stats.
    bns = []
    for i in range(4):
        gamma = 1.0 + 0.1 * jax.random.normal(keys[5 + i], (C,), jnp.float32)
        beta = 0.1 * jax.random.normal(keys[9 + i], (C,), jnp.float32)
        mean = 0.05 * (i + 1) * jax.random.normal(keys[13 + i], (C,), jnp.float32)
        var = 1.0 + 0.1 * jnp.abs(jax.random.normal(keys[17], (C,), jnp.float32))
        bns.append((gamma, beta, mean, var))

    # NoiseLayer noise init: randn(1, C, 1, 1).  Batch N != 1, so the PyTorch
    # forward collapses it to the single scalar noise[0, 0, 0, 0].
    noise1_init = jax.random.normal(keys[18], (1, C, 1, 1), jnp.float32)
    noise2_init = jax.random.normal(keys[19], (1, C, 1, 1), jnp.float32)
    noise = jnp.stack([noise1_init[0, 0, 0, 0],
                       noise2_init[0, 0, 0, 0]]).astype(jnp.float32)

    w1f, b1f = _fold_noise_layer(w1_oi, b1, bns[0], bns[1])
    w2f, b2f = _fold_noise_layer(w2_oi, b2, bns[2], bns[3])

    ref = _reference_nchw(x, w1_oi, b1, w2_oi, b2, bns, noise[0], noise[1])

    out = noise_basic_block(x, w1f, b1f, w2f, b2f, noise, io_dtype=io_dtype)
    out = jax.block_until_ready(out)
    assert out.shape == (N, C, H, W)
    ok = jnp.allclose(out.astype(jnp.float32), ref, atol=atol, rtol=rtol)
    assert ok, f"mismatch vs reference (N={N},C={C},H={H},W={W},dtype={io_dtype})"


if __name__ == "__main__":
    # Small shapes consistent with the module: residual add (shortcut=None)
    # requires in_planes == planes.
    # f32, spatial multiple of 128 lanes.
    _run_case(seed=0, N=2, C=8, H=16, W=16, io_dtype=None, atol=1e-4, rtol=1e-4)
    # f32, non-multiple-of-128 spatial (full-HW tile) + batch sub-blocking.
    _run_case(seed=1, N=4, C=16, H=14, W=14, io_dtype=None, atol=1e-4, rtol=1e-4)
    # bf16 HBM-I/O variant (v6e/v7x path; weights/compute stay f32 in-kernel).
    _run_case(seed=0, N=2, C=8, H=16, W=16, io_dtype=jnp.bfloat16,
              atol=0.1, rtol=0.1)

    print("KERNEL_OK")
</pallas_src>

<mosaic_0001>
module attributes {stable_mosaic.version = 11 : i64} {
  func.func @_noise_block_kernel(%arg0: i32, %arg1: i32, %arg2: memref<2xf32, #tpu.memory_space<smem>>, %arg3: memref<1x8x256xf32, #tpu.memory_space<vmem>>, %arg4: memref<8x8xf32, #tpu.memory_space<vmem>>, %arg5: memref<8x8xf32, #tpu.memory_space<vmem>>, %arg6: memref<8x2xf32, #tpu.memory_space<vmem>>, %arg7: memref<1x8x256xf32, #tpu.memory_space<vmem>>) attributes {dimension_semantics = [#tpu.dimension_semantics<parallel>, #tpu.dimension_semantics<parallel>], iteration_bounds = array<i64: 2, 1>, scalar_prefetch = 0 : i64, scratch_operands = 0 : i64, tpu.core_type = #tpu.core_type<tc>, window_params = [{transform_indices = @transform_0, window_bounds = array<i64: 2>}, {transform_indices = @transform_1, window_bounds = array<i64: 1, 8, 256>}, {pipeline_mode = #tpu.pipeline_mode<synchronous>, transform_indices = @transform_2, window_bounds = array<i64: 8, 8>}, {pipeline_mode = #tpu.pipeline_mode<synchronous>, transform_indices = @transform_3, window_bounds = array<i64: 8, 8>}, {pipeline_mode = #tpu.pipeline_mode<synchronous>, transform_indices = @transform_4, window_bounds = array<i64: 8, 2>}, {transform_indices = @transform_5, window_bounds = array<i64: 1, 8, 256>}]} {
    %c0 = arith.constant 0 : index
    %0 = memref.load %arg2[%c0] : memref<2xf32, #tpu.memory_space<smem>>
    %c1 = arith.constant 1 : index
    %1 = memref.load %arg2[%c1] : memref<2xf32, #tpu.memory_space<smem>>
    %cst = arith.constant 0.000000e+00 : f32
    %2 = arith.maximumf %1, %cst : f32
    %c0_0 = arith.constant 0 : index
    %c0_1 = arith.constant 0 : index
    %3 = vector.load %arg4[%c0_0, %c0_1] : memref<8x8xf32, #tpu.memory_space<vmem>>, vector<8x8xf32>
    %c0_2 = arith.constant 0 : index
    %c0_3 = arith.constant 0 : index
    %4 = vector.load %arg5[%c0_2, %c0_3] : memref<8x8xf32, #tpu.memory_space<vmem>>, vector<8x8xf32>
    %c0_4 = arith.constant 0 : index
    %c0_5 = arith.constant 0 : index
    %5 = vector.load %arg6[%c0_4, %c0_5] : memref<8x2xf32, #tpu.memory_space<vmem>>, vector<8x1xf32>
    %c0_6 = arith.constant 0 : index
    %c1_7 = arith.constant 1 : index
    %6 = vector.load %arg6[%c0_6, %c1_7] : memref<8x2xf32, #tpu.memory_space<vmem>>, vector<8x1xf32>
    %c0_8 = arith.constant 0 : index
    %c0_9 = arith.constant 0 : index
    %c0_10 = arith.constant 0 : index
    %7 = vector.load %arg3[%c0_8, %c0_9, %c0_10] : memref<1x8x256xf32, #tpu.memory_space<vmem>>, vector<1x8x256xf32>
    %8 = vector.shape_cast %7 : vector<1x8x256xf32> to vector<8x256xf32>
    %9 = vector.broadcast %0 : f32 to vector<8x256xf32>
    %10 = arith.addf %8, %9 : vector<8x256xf32>
    %cst_11 = arith.constant 0.000000e+00 : f32
    %11 = vector.broadcast %cst_11 : f32 to vector<8x256xf32>
    %12 = arith.maximumf %10, %11 : vector<8x256xf32>
    %cst_12 = arith.constant dense<0.000000e+00> : vector<8x256xf32>
    %13 = tpu.matmul %3, %12, %cst_12 {dimension_numbers = #tpu.dot_dimension_numbers<[1], [0], [0], [1], [0, 0, 1, 1], [], []>} : vector<8x8xf32>, vector<8x256xf32>, vector<8x256xf32> -> vector<8x256xf32>
    %14 = vector.broadcast %5 : vector<8x1xf32> to vector<8x256xf32>
    %15 = arith.addf %13, %14 : vector<8x256xf32>
    %16 = vector.broadcast %1 : f32 to vector<8x256xf32>
    %17 = arith.addf %15, %16 : vector<8x256xf32>
    %18 = vector.broadcast %2 : f32 to vector<8x256xf32>
    %19 = arith.maximumf %17, %18 : vector<8x256xf32>
    %cst_13 = arith.constant dense<0.000000e+00> : vector<8x256xf32>
    %20 = tpu.matmul %4, %19, %cst_13 {dimension_numbers = #tpu.dot_dimension_numbers<[1], [0], [0], [1], [0, 0, 1, 1], [], []>} : vector<8x8xf32>, vector<8x256xf32>, vector<8x256xf32> -> vector<8x256xf32>
    %21 = vector.broadcast %6 : vector<8x1xf32> to vector<8x256xf32>
    %22 = arith.addf %20, %21 : vector<8x256xf32>
    %c0_14 = arith.constant 0 : index
    %c0_15 = arith.constant 0 : index
    %c0_16 = arith.constant 0 : index
    %23 = vector.load %arg3[%c0_14, %c0_15, %c0_16] : memref<1x8x256xf32, #tpu.memory_space<vmem>>, vector<1x8x256xf32>
    %24 = vector.shape_cast %23 : vector<1x8x256xf32> to vector<8x256xf32>
    %25 = arith.addf %22, %24 : vector<8x256xf32>
    %cst_17 = arith.constant 0.000000e+00 : f32
    %26 = vector.broadcast %cst_17 : f32 to vector<8x256xf32>
    %27 = arith.maximumf %25, %26 : vector<8x256xf32>
    %c0_18 = arith.constant 0 : index
    %c0_19 = arith.constant 0 : index
    %c0_20 = arith.constant 0 : index
    %28 = vector.load %arg7[%c0_18, %c0_19, %c0_20] : memref<1x8x256xf32, #tpu.memory_space<vmem>>, vector<1x8x256xf32>
    %29 = vector.shape_cast %28 : vector<1x8x256xf32> to vector<8x256xf32>
    %30 = vector.shape_cast %27 : vector<8x256xf32> to vector<1x8x256xf32>
    tpu.vector_store %arg7[%c0_18, %c0_19, %c0_20], %30 {strides = array<i32>} : memref<1x8x256xf32, #tpu.memory_space<vmem>>, vector<1x8x256xf32>,
    return
  }
  func.func @transform_0(%arg0: i32, %arg1: i32) -> i32 {
    %c0_i32 = arith.constant 0 : i32
    %c0_i32_0 = arith.constant 0 : i32
    return %c0_i32 : i32
  }
  func.func @transform_1(%arg0: i32, %arg1: i32) -> (i32, i32, i32) {
    %c0_i32 = arith.constant 0 : i32
    %c0_i32_0 = arith.constant 0 : i32
    return %arg0, %c0_i32, %arg1 : i32, i32, i32
  }
  func.func @transform_2(%arg0: i32, %arg1: i32) -> (i32, i32) {
    %c0_i32 = arith.constant 0 : i32
    %c0_i32_0 = arith.constant 0 : i32
    %c0_i32_1 = arith.constant 0 : i32
    return %c0_i32, %c0_i32_0 : i32, i32
  }
  func.func @transform_3(%arg0: i32, %arg1: i32) -> (i32, i32) {
    %c0_i32 = arith.constant 0 : i32
    %c0_i32_0 = arith.constant 0 : i32
    %c0_i32_1 = arith.constant 0 : i32
    return %c0_i32, %c0_i32_0 : i32, i32
  }
  func.func @transform_4(%arg0: i32, %arg1: i32) -> (i32, i32) {
    %c0_i32 = arith.constant 0 : i32
    %c0_i32_0 = arith.constant 0 : i32
    %c0_i32_1 = arith.constant 0 : i32
    return %c0_i32, %c0_i32_0 : i32, i32
  }
  func.func @transform_5(%arg0: i32, %arg1: i32) -> (i32, i32, i32) {
    %c0_i32 = arith.constant 0 : i32
    %c0_i32_0 = arith.constant 0 : i32
    return %arg0, %c0_i32, %arg1 : i32, i32, i32
  }
}

</mosaic_0001>

<bundles_post_ra>
// kernel: tpu_custom_call.1
= control target key start
LH: loop header
LB: loop body
LE: loop exit
PB: predicated region body
PF: predicated region fallthrough
CT: control target
= control target key end

     0   :  { %10 = vsyncpa [#allocation5], 0  ;;  %s1056_s0 = inlined_call_operand.vmem [shape: f32[2], index: 0, kind: input, shape index: {}]   ;;  %s1057_s1 = inlined_call_operand.hbm [shape: f32[2,8,256], index: 1, kind: input, shape index: {}]   ;;  %s1058_s2 = inlined_call_operand.vmem [shape: f32[8,8], index: 2, kind: input, shape index: {}]   ;;  %s1059_s3 = inlined_call_operand.vmem [shape: f32[8,8], index: 3, kind: input, shape index: {}]   ;;  %s1060_s4 = inlined_call_operand.vmem [shape: f32[8,2], index: 4, kind: input, shape index: {}]   ;;  %s1061_s5 = inlined_call_operand.hbm [shape: f32[2,8,256], index: 5, kind: output, shape index: {}]  }
   0x1   :  { %11 = vsyncpa [#allocation3], 0 }
   0x2   :  { %13 = vsyncpa [#allocation3 + $0x1], 0 }
   0x3   :  { %14 = vsyncpa [#allocation4], 0 }
   0x4   :  { %16 = vsyncpa [#allocation4 + $0x1], 0  ;;  %s842_s18 = smov 0   ;;  %s844_s19 = smov 0  }
   0x5   :  { %s846_s20 = smov 0   ;;  %s848_s21 = smov 0  }
   0x6   :  { %s850_s22 = smov 0   ;;  %s852_s23 = smov 0  }
   0x7 LB: > { %s571_s24 = sadd.s32 4294967295, %s803_s23   ;;  %s572_s25 = sadd.s32 4294967294, %s803_s23   ;;  %s803_s23 = sphi %s852_s23, %s22_s23   ;;  %s799_s22 = sphi %s850_s22, %s1083_s22   ;;  %s795_s21 = sphi %s848_s21, %s1082_s21   ;;  %s791_s20 = sphi %s846_s20, %s1081_s20   ;;  %s787_s19 = sphi %s844_s19, %s1080_s19   ;;  %s783_s18 = sphi %s842_s18, %s1079_s18  }
   0x8   : > { %p77_p0 = scmp.ne.s32.totalorder %s787_s19, %s783_s18  ;;  %p876_p1 = scmp.eq.s32.totalorder %s571_s24, 0 }
   0x9   : > { %p880_p2 = scmp.eq.s32.totalorder %s571_s24, 1  ;;  %p172_p3 = scmp.eq.s32.totalorder %s572_s25, 1 }
   0xa   : > { %s1066_s26 = scalar_select %p876_p1, 1, 0 }
   0xb   : > { %p886_p4 = por %p876_p1, %p77_p0  ;;  %p573_p5 = scmp.ge.s32.totalorder %s803_s23, 1 }
   0xc   : > { %p891_p6 = por %p172_p3, %p77_p0  ;;  %p179_p7 = scmp.lt.s32.totalorder %s803_s23, 3 }
   0xd   : > { %s1068_s28 = scalar_select %p886_p4, 1, 0 }
   0xe   : > { %s1069_s29 = scalar_select %p891_p6, 1, 0 }
   0xf   : > { %s192_s7 = sshll.u32 %s1056_s0, 4  ;;  %p899_p8 = pnand %p573_p5, %p179_p7  ;;  %s193_s7 = int_to_ptr.vmem [resolvable:$true] %s192_s7 }
  0x10   : > { %s34_s10 = sadd.s32 1, %s799_s22  ;;  %s64_s11 = sadd.s32 1, %s791_s20 }
  0x11   : > { %p601_p10 = pneg %p899_p8  ;;  %p36_p12 = scmp.ge.s32.totalorder %s34_s10, 2 }
  0x12   : > { %s672_s12 = scalar_lea.vmem %s193_s7, 16  ;;  %p680_p7 = scmp.lt.s32.totalorder %s193_s7, %s193_s7 }
  0x13   : > { %p908_p11 = pnand %p601_p10, %p876_p1  ;;  %p673_p13 = scmp.ne.s32.totalorder %s193_s7, %s672_s12 }
  0x14   : > { %p681_p6 = scmp.lt.s32.totalorder %s672_s12, %s672_s12 }
  0x15   : > { %p674_p0 = pneg %p908_p11 }
  0x16   : > { %p682_p9 = por %p681_p6, %p680_p7 }
  0x17   : > { %p675_p3 = pnand %p674_p0, %p673_p13 }
  0x19   : > { %p676_p5 = pneg %p675_p3 }
  0x1b   : > { %p683_p4 = pnand %p682_p9, %p676_p5 }
  0x1d   : > { %686 = shalt.err (!%p683_p4)
}
  0x1e   : > { %s805_s13 = smov [#allocation2]   ;;  %s1085_s10 = smov (%p36_p12, %s34_s10), 0 }
  0x1f   : > { %604 = dma.vmem_to_smem (!%p908_p11), %s193_s7, 16, %s805_s13, [#allocation5]  }
  0x20   : > { %p71_p10 = scmp.ne.s32.totalorder %s791_s20, %s787_s19  ;;  %p72_p6 = scmp.eq.s32.totalorder %s803_s23, 0 }
  0x21   : > { %s59_s14 = ssub.s32 %s799_s22, %s1085_s10  ;;  %p614_p4 = scmp.lt.s32.totalorder %s803_s23, 2 }
  0x22   : > { %p62_p9 = scmp.eq.s32.totalorder %s59_s14, 0  ;;  %p73_p13 = por %p72_p6, %p71_p10 }
  0x23   : > { %p928_p0 = por %p880_p2, %p71_p10  ;;  %s212_s16 = sand.u32 1, %s791_s20  }
  0x24   : > { %s934_s17 = scalar_select %p62_p9, %s791_s20, %s64_s11  }
  0x25   : > { %s1072_s15 = scalar_select %p928_p0, 1, 0 }
  0x26   : > { %s576_s24 = sshll.u32 %s212_s16, 4  ;;  %s591_s25 = sshll.u32 %s799_s22, 8 }
  0x27   : > { %s940_s7 = scalar_lea.hbm %s1057_s1, %s591_s25  ;;  %s216_s9 = scalar_lea.vmem [#allocation6], %s576_s24 }
  0x28   : > { %s226_s27 = sshll.u32 %s216_s9, 4  ;;  %p944_p2 = pnand %p614_p4, %p73_p13  ;;  %s942_s27 = int_to_ptr.vmem [resolvable:$true] %s226_s27 }
  0x29   : > { %s213_s11 = scalar_lea.sflag [#allocation3], %s212_s16  ;;  %s687_s13 = scalar_lea.hbm %s940_s7, 256 }
  0x2a   : > { %p688_p11 = scmp.ne.s32.totalorder %s940_s7, %s687_s13  ;;  %p689_p12 = pneg %p944_p2 }
  0x2b   : > { %s692_s25 = scalar_lea.hbm %s1057_s1, 512  ;;  %p693_p7 = scmp.lt.u32.totalorder %s940_s7, %s1057_s1 }
  0x2c   : > { %p690_p3 = pnand %p689_p12, %p688_p11  ;;  %p694_p10 = scmp.lt.u32.totalorder %s692_s25, %s687_s13 }
  0x2d   : > { %p696_p4 = scmp.lt.u32.totalorder %s687_s13, %s940_s7 }
  0x2e   : > { %p691_p5 = pneg %p690_p3  ;;  %p695_p6 = por %p694_p10, %p693_p7 }
  0x30   : > { %p697_p9 = por %p696_p4, %p695_p6 }
  0x32   : > { %p698_p13 = pnand %p697_p9, %p691_p5 }
  0x34   : > { %701 = shalt.err (!%p698_p13)
}
  0x35   : > { %s702_s16 = scalar_lea.vmem %s942_s27, 256  ;;  %s806_s9 = smov [#allocation6]  }
  0x36   : > { %p703_p11 = scmp.ne.s32.totalorder %s942_s27, %s702_s16  ;;  %s707_s14 = sshll.u32 %s806_s9, 4  ;;  %s708_s14 = int_to_ptr.vmem [resolvable:$false] %s707_s14 }
  0x37   : > { %s709_s24 = scalar_lea.vmem %s708_s14, 512  ;;  %p710_p1 = scmp.lt.s32.totalorder %s942_s27, %s708_s14 }
  0x38   : > { %p705_p3 = pnand %p703_p11, %p689_p12  ;;  %p711_p7 = scmp.lt.s32.totalorder %s709_s24, %s702_s16 }
  0x3a   : > { %p706_p0 = pneg %p705_p3  ;;  %p712_p10 = por %p711_p7, %p710_p1 }
  0x3c   : > { %p713_p6 = pnand %p712_p10, %p706_p0 }
  0x3e   : > { %716 = shalt.err (!%p713_p6)
}
  0x3f   : > { %608 = dma.hbm_to_vmem [thread:$0]  (!%p944_p2), %s940_s7, 256, %s942_s27, %s213_s11  }
  0x40   : > { %235 = sbr.rel (%p899_p8) target bundleno = 545 (0x221), region = 40  ;;  %p1074_p12 = scmp.ne.s32.totalorder (!%p899_p8), %s1066_s26, 0 }
  0x47   : > { %770 = dma.done.wait (%p1074_p12), [#allocation5], 16  }
  0x48   : > { %772 = vsyncadd (%p1074_p12), [#allocation5], 4294967280  ;;  %s980_s13 = sand.u32 1, %s787_s19   ;;  %p1075_p1 = scmp.ne.s32.totalorder %s1068_s28, 0 }
  0x49   : > { %s581_s12 = sshll.u32 %s980_s13, 4  ;;  %s242_s25 = scalar_lea.sflag [#allocation3], %s980_s13 }
  0x4a   : > { %s245_s7 = scalar_lea.vmem [#allocation6], %s581_s12 }
  0x4b   : > { %774 = dma.done.wait (%p1075_p1), %s242_s25, 256  }
  0x4c   : > { %776 = vsyncadd (%p1075_p1), %s242_s25, 4294967040 }
  0x4d   : > { %250 = sfence }
  0x4e   : > { %s275_s8 = sld [smem:[#allocation2]]  ;;  %v807_v0 = vmov 0.0   ;;  %v280_v1 = vld [vmem:[%s1060_s4] sm:$0xff]  ;;  %v808_v2 = vmov 0   ;;  %v282_v3 = vld [vmem:[%s245_s7 + $0x8] sm:$0xff]  ;;  %vm293_vm0 = vcmask 64512  }
  0x4f   : > { %361 = vmatprep.mubr.f32.mxu0 %v807_v0  ;;  %445 = vmatprep.mubr.f32.mxu1 %v807_v0  ;;  %v281_v4 = vld [vmem:[%s245_s7] sm:$0xff]  ;;  %v809_v11 = vmov 1   ;;  %s583_s30 = sld [smem:[#allocation2 + $0x1]]  ;;  %s810_s6 = smov 0.0  }
  0x50   : > { %670 = vset.pattern.permute.xlu0 %v808_v2  ;;  %v278_v10 = vld [vmem:[%s1058_s2] sm:$0xff]  ;;  %s592_s24 = sshll.u32 %s795_s21, 8  ;;  %s272_s25 = scalar_lea.vmem [#allocation7], %s581_s12 }
  0x51   : > { %290 = vperm.xlu0 %670, %v280_v1   ;;  %v279_v23 = vld [vmem:[%s1059_s3] sm:$0xff]  ;;  %s475_s7 = sshll.u32 %s272_s25, 4  ;;  %s1007_s27 = scalar_lea.hbm %s1061_s5, %s592_s24  ;;  %s1009_s7 = int_to_ptr.vmem [resolvable:$true] %s475_s7 }
  0x52   : > { %s459_s28 = scalar_lea.sflag [#allocation4], %s980_s13  ;;  %s717_s21 = scalar_lea.vmem %s1009_s7, 256 }
  0x53   : > { %p718_p8 = scmp.ne.s32.totalorder %s1009_s7, %s717_s21  ;;  %p1076_p0 = scmp.ne.s32.totalorder %s1072_s15, 0 }
  0x54   : > { %v283_v5 = vstv %s275_s8  ;;  %s811_s12 = smov [#allocation7]  }
  0x55   : > { %v285_v6 = vadd.f32 %v283_v5, %v282_v3  ;;  %v284_v7 = vadd.f32 %v283_v5, %v281_v4  ;;  %671 = vset.pattern.permute.xlu0 %v809_v11  ;;  %v368_v14 = vstv %s583_s30  ;;  %s277_s16 = smax.f32 %s810_s6, %s583_s30  ;;  %p719_p2 = pnand %p718_p8, %p1076_p0 }
  0x56   : > { %375 = vperm.xlu0 %671, %v280_v1   ;;  %v371_v19 = vstv %s277_s16  ;;  %s721_s11 = sshll.u32 %s811_s12, 4  ;;  %s722_s11 = int_to_ptr.vmem [resolvable:$false] %s721_s11 }
  0x57   : > { %v287_v8 = vmax.f32 %v285_v6, 0.0  ;;  %v286_v9 = vmax.f32 %v284_v7, 0.0  ;;  %p720_p5 = pneg %p719_p2  ;;  %s723_s30 = scalar_lea.vmem %s722_s11, 512 }
  0x58   : > { %p724_p4 = scmp.lt.s32.totalorder %s1009_s7, %s722_s11  ;;  %p725_p9 = scmp.lt.s32.totalorder %s723_s30, %s717_s21 }
  0x59   : > { %297 = vmatprep.subr.mxu0 %v287_v8 }
  0x5a   : > { %298 = vmatpush1.msra.mxu0 %v286_v9  ;;  %p726_p13 = por %p725_p9, %p724_p4 }
  0x5b   : > { %584 = vmatmul.mubr.msk.f32.vlgmr.msra.gmra.mrb[0].mxu0 %vm293_vm0, %v278_v10 }
  0x5c   : > { %p727_p11 = pnand %p726_p13, %p720_p5 }
  0xd0   : > { %v291_v12 = vpop.permute.xlu0 %290 }
  0xd5   : > { %v376_v24 = vpop.permute.xlu0 %375 }
 0x12e   : > { %v363_v13 = vpop.f32.mrb[0].mxu0 }
 0x12f   : > { %v364_v15 = vadd.f32 %v363_v13, %v291_v12  ;;  %v365_v16 = vpop.f32.mrb[1].mxu0 }
 0x130   : > { %v366_v17 = vadd.f32 %v365_v16, %v291_v12 }
 0x131   : > { %v369_v18 = vadd.f32 %v368_v14, %v364_v15 }
 0x132   : > { %v370_v20 = vadd.f32 %v368_v14, %v366_v17 }
 0x133   : > { %v372_v22 = vmax.f32 %v369_v18, %v371_v19 }
 0x134   : > { %v373_v21 = vmax.f32 %v370_v20, %v371_v19 }
 0x136   : > { %381 = vmatprep.subr.mxu1 %v373_v21 }
 0x137   : > { %382 = vmatpush1.msra.mxu1 %v372_v22 }
 0x138   : > { %585 = vmatmul.mubr.msk.f32.vlgmr.msra.gmra.mrb[0].mxu1 %vm293_vm0, %v279_v23 }
 0x20b   : > { %v447_v25 = vpop.f32.mrb[0].mxu1 }
 0x20c   : > { %v448_v26 = vadd.f32 %v447_v25, %v376_v24  ;;  %v449_v27 = vpop.f32.mrb[1].mxu1 }
 0x20d   : > { %v450_v28 = vadd.f32 %v449_v27, %v376_v24 }
 0x20e   : > { %v452_v29 = vadd.f32 %v448_v26, %v281_v4 }
 0x20f   : > { %v453_v30 = vadd.f32 %v450_v28, %v282_v3 }
 0x210   : > { %v454_v31 = vmax.f32 %v452_v29, 0.0 }
 0x211   : > { %v455_v32 = vmax.f32 %v453_v30, 0.0 }
 0x212   : > { %456 = vst [vmem:[%s272_s25] sm:$0xff] %v454_v31 }
 0x213   : > { %457 = vst [vmem:[%s272_s25 + $0x8] sm:$0xff] %v455_v32 }
 0x214   : > { %730 = shalt.err (!%p727_p11)
}
 0x215   : > { %s731_s13 = scalar_lea.hbm %s1007_s27, 256  ;;  %s735_s9 = scalar_lea.hbm %s1061_s5, 512 }
 0x216   : > { %p732_p3 = scmp.ne.s32.totalorder %s1007_s27, %s731_s13  ;;  %p736_p6 = scmp.lt.u32.totalorder %s1007_s27, %s1061_s5 }
 0x217   : > { %p737_p12 = scmp.lt.u32.totalorder %s735_s9, %s731_s13  ;;  %p739_p8 = scmp.lt.u32.totalorder %s731_s13, %s1007_s27 }
 0x218   : > { %p733_p7 = pnand %p732_p3, %p1076_p0 }
 0x219   : > { %p738_p1 = por %p737_p12, %p736_p6 }
 0x21a   : > { %p734_p10 = pneg %p733_p7 }
 0x21b   : > { %p740_p2 = por %p739_p8, %p738_p1 }
 0x21d   : > { %p741_p5 = pnand %p740_p2, %p734_p10 }
 0x21f   : > { %744 = shalt.err (!%p741_p5)
}
 0x220   : > { %599 = dma.vmem_to_hbm [thread:$0]  (%p1076_p0), %s1009_s7, 256, %s1007_s27, %s459_s28  }
 0x221 PF: > { %s487_s25 = sand.u32 1, %s783_s18   ;;  %p1077_p4 = scmp.ne.s32.totalorder %s1069_s29, 0 }
 0x222   : > { %p1078_p9 = scmp.ge.s32.totalorder %s803_s23, 2  ;;  %s488_s8 = scalar_lea.sflag [#allocation4], %s487_s25 }
 0x224   : > { %p610_p13 = pnand %p1078_p9, %p1077_p4 }
 0x226   : > { %778 = dma.done.wait (!%p610_p13), %s488_s8, 256  }
 0x227   : > { %780 = vsyncadd (!%p610_p13), %s488_s8, 4294967040  ;;  %s22_s23 = sadd.s32 1, %s803_s23   ;;  %s1079_s18 = smov %s787_s19 }
 0x228   : > { %p19_p11 = scmp.ge.s32.totalorder %s22_s23, 4   ;;  %s1080_s19 = smov %s791_s20 }
 0x229   : > { %s1081_s20 = smov %s934_s17  ;;  %s1082_s21 = smov %s799_s22 }
 0x22a   : > { %s1083_s22 = smov %s1085_s10  ;;  %21 = sbr.rel (!%p19_p11) target bundleno = 7 (0x7), region = 90 }
 0x231   :  { %493 = vsyncpa [#allocation3], 1 }
 0x232   :  { %495 = vsyncpa [#allocation3 + $0x1], 1 }
 0x233   :  { %496 = vsyncpa [#allocation4], 1 }
 0x234   :  { %498 = vsyncpa [#allocation4 + $0x1], 1 }
 0x235   :  { %499 = vsyncpa [#allocation5], 1 }
 0x236   :  { %501 = vsyncpa [#allocation5 + $0x1], 1 }

</bundles_post_ra>
